<compile_context>
chip_gen: v7x
topology: tpu7x:2x2x1
jax: 0.10.0
libtpu: 0.0.40
codegen_flags: <defaults>
</compile_context>

<pallas_src>
import math

import jax
import jax.numpy as jnp
from jax.experimental import pallas as pl
from jax.experimental.pallas import tpu as pltpu


def _round_up(a: int, b: int) -> int:
    return ((a + b - 1) // b) * b


def _cdiv(a: int, b: int) -> int:
    return (a + b - 1) // b


def _drop_path_kernel(scale_ref, x_ref, o_ref):
    # scale_ref: (TB, 1) per-sample scale (0 or 1/keep_prob) in x.dtype.
    # x_ref / o_ref: (TB, TC) lane-dense payload tile.
    o_ref[...] = x_ref[...] * scale_ref[...]


def _choose_tiles(B: int, L: int, itemsize: int, target_bytes: int = 4 << 20):
    """Pick a (TB, TC) block for the (B, L) payload.

    TC is a multiple of 128 (lane-dense); TB is a multiple of 8 or equals B, so
    the (8, 128) BlockSpec constraint always holds.  Ragged edges are left to
    the ceil-div grid (partial edge blocks), never physically padded.
    """
    Lp = _round_up(max(L, 1), 128)
    TB, TC = B, Lp
    # Shrink the column tile toward ~target_bytes.
    if TB * TC * itemsize > target_bytes:
        tc = (target_bytes // max(TB * itemsize, 1)) // 128 * 128
        TC = min(max(tc, 128), Lp)
    # Still too big (very large batch): tile the batch dim too.
    if TB * TC * itemsize > target_bytes and B > 8:
        tb = (target_bytes // max(TC * itemsize, 1)) // 8 * 8
        TB = min(max(tb, 8), B)
    # v7x megacore: split large payloads into >= 4 grid steps so both
    # TensorCores get work; keep blocks at least ~512 lanes wide.
    if B * Lp * itemsize >= (2 << 20):
        while _cdiv(B, TB) * _cdiv(Lp, TC) < 4 and TC > 512:
            TC = max(512, _round_up(_cdiv(TC, 2), 128))
    return int(TB), int(TC)


def drop_path_pallas(x, key, drop_prob: float = 0.0, training: bool = False):
    """Pallas DropPath forward.  x: (B, ...) of any rank >= 1."""
    if drop_prob == 0.0 or not training:
        return x
    keep_prob = 1.0 - drop_prob

    B = x.shape[0]
    orig_shape = x.shape
    L = int(math.prod(x.shape[1:]))
    itemsize = jnp.dtype(x.dtype).itemsize

    # Per-sample {0, 1/keep_prob} scale, mirroring
    # torch.rand(shape, dtype=x.dtype) + floor.  Using jnp division keeps
    # drop_prob == 1.0 at inf/nan semantics instead of a Python ZeroDivisionError.
    # TODO(synk): jax.random is used for the per-sample draw; the RNG stream is
    # not bit-identical to torch.rand but the distribution/semantics match.
    u = jax.random.uniform(key, (B,), dtype=x.dtype)
    mask = jnp.floor(keep_prob + u)                              # {0, 1} in x.dtype
    scale = (mask / jnp.asarray(keep_prob, x.dtype)).reshape(B, 1)

    x2 = x.reshape(B, L)                                         # free minor-dim merge
    TB, TC = _choose_tiles(B, L, itemsize)
    grid = (_cdiv(B, TB), _cdiv(L, TC))

    out2 = pl.pallas_call(
        _drop_path_kernel,
        out_shape=jax.ShapeDtypeStruct((B, L), x.dtype),
        grid=grid,
        in_specs=[
            pl.BlockSpec((TB, 1), lambda i, j: (i, 0)),          # per-sample scale
            pl.BlockSpec((TB, TC), lambda i, j: (i, j)),         # payload tile
        ],
        out_specs=pl.BlockSpec((TB, TC), lambda i, j: (i, j)),
        compiler_params=pltpu.CompilerParams(
            dimension_semantics=("parallel", "parallel"),
            vmem_limit_bytes=48 << 20,
        ),
    )(scale, x2)

    return out2.reshape(orig_shape)


def _drop_path_ref(x, u, drop_prob, training):
    """Pure-JAX reference mirroring the PyTorch drop_path."""
    if drop_prob == 0.0 or not training:
        return x
    keep_prob = 1.0 - drop_prob
    shape = (x.shape[0],) + (1,) * (x.ndim - 1)
    random_tensor = jnp.floor(keep_prob + u.reshape(shape))
    return (x / keep_prob) * random_tensor


if __name__ == "__main__":
    key = jax.random.PRNGKey(0)
    k_x, k_u = jax.random.split(key)

    drop_prob = 0.25

    # --- primary small test: (B, N, D) = (2, 8, 32) f32 ---
    B, N, D = 2, 8, 32
    x = jax.random.normal(k_x, (B, N, D), dtype=jnp.float32)

    # eval mode: identity
    y_eval = jax.block_until_ready(
        drop_path_pallas(x, k_u, drop_prob=drop_prob, training=False))
    assert jnp.array_equal(y_eval, x), "eval-mode DropPath must be identity"

    # training mode: per-sample mask + rescale
    y_train = jax.block_until_ready(
        drop_path_pallas(x, k_u, drop_prob=drop_prob, training=True))
    u = jax.random.uniform(k_u, (B,), dtype=x.dtype)
    y_ref = _drop_path_ref(x, u, drop_prob, training=True)
    assert jnp.allclose(y_train, y_ref, atol=1e-6, rtol=1e-5), "mismatch vs reference"

    # --- ragged per-sample length (L = 4800, not a multiple of 128) ---
    B2, N2, D2 = 2, 50, 96
    x2 = jax.random.normal(k_x, (B2, N2, D2), dtype=jnp.float32)
    k_u2 = jax.random.fold_in(k_u, 1)
    y2 = jax.block_until_ready(
        drop_path_pallas(x2, k_u2, drop_prob=drop_prob, training=True))
    u2 = jax.random.uniform(k_u2, (B2,), dtype=x2.dtype)
    y2_ref = _drop_path_ref(x2, u2, drop_prob, training=True)
    assert jnp.allclose(y2, y2_ref, atol=1e-6, rtol=1e-5), "mismatch (ragged shape)"

    print("KERNEL_OK")
</pallas_src>

<mosaic_0001>
module attributes {stable_mosaic.version = 11 : i64} {
  func.func @_drop_path_kernel(%arg0: i32, %arg1: i32, %arg2: memref<2x1xf32, #tpu.memory_space<vmem>>, %arg3: memref<2x256xf32, #tpu.memory_space<vmem>>, %arg4: memref<2x256xf32, #tpu.memory_space<vmem>>) attributes {dimension_semantics = [#tpu.dimension_semantics<parallel>, #tpu.dimension_semantics<parallel>], iteration_bounds = array<i64: 1, 1>, scalar_prefetch = 0 : i64, scratch_operands = 0 : i64, tpu.core_type = #tpu.core_type<tc>, window_params = [{transform_indices = @transform_0, window_bounds = array<i64: 2, 1>}, {transform_indices = @transform_1, window_bounds = array<i64: 2, 256>}, {transform_indices = @transform_2, window_bounds = array<i64: 2, 256>}]} {
    %c0 = arith.constant 0 : index
    %c0_0 = arith.constant 0 : index
    %0 = vector.load %arg3[%c0, %c0_0] : memref<2x256xf32, #tpu.memory_space<vmem>>, vector<2x256xf32>
    %c0_1 = arith.constant 0 : index
    %c0_2 = arith.constant 0 : index
    %1 = vector.load %arg2[%c0_1, %c0_2] : memref<2x1xf32, #tpu.memory_space<vmem>>, vector<2x1xf32>
    %2 = vector.broadcast %1 : vector<2x1xf32> to vector<2x256xf32>
    %3 = arith.mulf %0, %2 : vector<2x256xf32>
    %c0_3 = arith.constant 0 : index
    %c0_4 = arith.constant 0 : index
    %4 = vector.load %arg4[%c0_3, %c0_4] : memref<2x256xf32, #tpu.memory_space<vmem>>, vector<2x256xf32>
    tpu.vector_store %arg4[%c0_3, %c0_4], %3 {strides = array<i32>} : memref<2x256xf32, #tpu.memory_space<vmem>>, vector<2x256xf32>,
    return
  }
  func.func @transform_0(%arg0: i32, %arg1: i32) -> (i32, i32) {
    %c0_i32 = arith.constant 0 : i32
    %c0_i32_0 = arith.constant 0 : i32
    return %arg0, %c0_i32 : i32, i32
  }
  func.func @transform_1(%arg0: i32, %arg1: i32) -> (i32, i32) {
    %c0_i32 = arith.constant 0 : i32
    return %arg0, %arg1 : i32, i32
  }
  func.func @transform_2(%arg0: i32, %arg1: i32) -> (i32, i32) {
    %c0_i32 = arith.constant 0 : i32
    return %arg0, %arg1 : i32, i32
  }
}

</mosaic_0001>

<bundles_post_ra>
// kernel: tpu_custom_call.1
= control target key start
LH: loop header
LB: loop body
LE: loop exit
PB: predicated region body
PF: predicated region fallthrough
CT: control target
= control target key end

     0   :  { %v70_v1 = vmov 0   ;;  %s106_s0 = inlined_call_operand.vmem [shape: f32[2,1], index: 0, kind: input, shape index: {}]   ;;  %s107_s1 = inlined_call_operand.vmem [shape: f32[2,256], index: 1, kind: input, shape index: {}]   ;;  %s108_s2 = inlined_call_operand.hbm [shape: f32[2,256], index: 2, kind: output, shape index: {}]  }
   0x1   :  { %v13_v0 = vld [vmem:[%s106_s0] sm:$0x3]  ;;  %45 = vset.pattern.permute.xlu0 %v70_v1 }
   0x2   :  { %7 = vsyncpa [#allocation3], 0  ;;  %16 = vperm.xlu0 %45, %v13_v0   ;;  %v71_v2 = vmov 269488144   ;;  %v21_v4 = vlaneseq  ;;  %v12_v9 = vld [vmem:[%s107_s1] sm:$0xf] }
   0x3   :  { %v19_v3 = vunpack.c.l.s4 %v71_v2  ;;  %s72_s13 = smov [#allocation2]  }
   0x4   :  { %v22_v6 = vshrl.u32 %v21_v4, 7  ;;  %s34_s14 = sshll.u32 %s72_s13, 4  ;;  %s35_s14 = int_to_ptr.vmem [resolvable:$true] %s34_s14 }
   0x5   :  { %v20_v5 = vunpack.c.0.s8 %v19_v3  ;;  %s46_s0 = scalar_lea.vmem %s35_s14, 64  ;;  %p51_p1 = scmp.lt.s32.totalorder %s35_s14, %s35_s14 }
   0x6   :  { %p47_p0 = scmp.ne.s32.totalorder %s35_s14, %s46_s0  ;;  %p52_p2 = scmp.lt.s32.totalorder %s46_s0, %s46_s0 }
   0x7   :  { %v23_v7 = vsub.s32 %v20_v5, %v22_v6 }
   0x8   :  { %p53_p3 = por %p52_p2, %p51_p1 }
   0xa   :  { %p54_p4 = pnand %p53_p3, %p47_p0 }
  0x81   :  { %v17_v8 = vpop.permute.xlu0 %16 }
  0x82   :  { %v24_v10 = vrot.slane %v17_v8, %v23_v7 }
  0x84   :  { %v26_v11 = vmul.f32 %v24_v10, %v12_v9 }
  0x86   :  { %27 = vst [vmem:[#allocation2] sm:$0xf] %v26_v11 }
  0x87   :  { %57 = shalt.err (!%p54_p4)
}
  0x88   :  { %s58_s17 = scalar_lea.hbm %s108_s2, 64 }
  0x89   :  { %p59_p5 = scmp.ne.s32.totalorder %s108_s2, %s58_s17  ;;  %p62_p6 = scmp.lt.u32.totalorder %s58_s17, %s108_s2 }
  0x8b   :  { %p64_p7 = pnand %p62_p6, %p59_p5 }
  0x8d   :  { %67 = shalt.err (!%p64_p7)
}
  0x8e   :  { %37 = dma.vmem_to_hbm [thread:$0]  %s35_s14, 64, %s108_s2, [#allocation3]  }
  0x8f   :  { %68 = dma.done.wait [#allocation3], 64  }
  0x90   :  { %69 = vsyncadd [#allocation3], 4294967232 }
  0x91   :  { %41 = vsyncpa [#allocation3], 1 }

</bundles_post_ra>
